<compile_context>
chip_gen: v7x
topology: tpu7x:2x2x1
jax: 0.10.0
libtpu: 0.0.40
codegen_flags: <defaults>
</compile_context>

<pallas_src>
import functools

import jax
import jax.numpy as jnp
from jax.experimental import pallas as pl
from jax.experimental.pallas import tpu as pltpu

LN_EPS = 1e-5


def _round_up(x, m):
    return ((x + m - 1) // m) * m


def _vmem_capacity_bytes():
    """Physical VMEM per core; conservative (v7x-sized) fallback if unavailable."""
    try:
        cap = getattr(pltpu.get_tpu_info(), "vmem_capacity_bytes", None)
        if cap:
            return int(cap)
    except Exception:
        pass
    return 64 * 1024 * 1024


def _linear_layer_kernel(x_ref, gamma_ref, beta_ref, w_ref, b_ref, o_ref, xn_ref,
                         *, d_true, d_pad):
    # x_ref:      (TM, Dp)  bf16 input rows (zero-padded cols / tail rows)
    # gamma/beta: (1, Dp)   f32, zero-padded
    # w_ref:      (Dp, TN)  bf16, transposed + zero-padded weight tile
    # b_ref:      (1, TN)   f32, zero-padded bias tile
    # o_ref:      (TM, TN)  output tile
    # xn_ref:     (TM, Dp)  bf16 VMEM scratch: LN output, reused across the D_out axis.

    @pl.when(pl.program_id(1) == 0)
    def _():
        x = x_ref[...].astype(jnp.float32)
        # LayerNorm over the true feature width (biased variance, like torch.nn.LayerNorm).
        mean = jnp.sum(x, axis=-1, keepdims=True) * (1.0 / d_true)
        centered = x - mean
        if d_true != d_pad:
            col = jax.lax.broadcasted_iota(jnp.int32, (1, d_pad), 1)
            centered = jnp.where(col < d_true, centered, 0.0)
        var = jnp.sum(centered * centered, axis=-1, keepdims=True) * (1.0 / d_true)
        xn = centered * jax.lax.rsqrt(var + LN_EPS)
        xn = xn * gamma_ref[...] + beta_ref[...]
        # Dropout is identity in eval mode (inference semantics).
        # TODO(synk): training-mode dropout (stateful PRNG mask) not implemented.
        xn_ref[...] = xn.astype(jnp.bfloat16)

    # Linear: bf16 operands into the MXU, f32 accumulation; then bias + ReLU.
    y = jnp.dot(xn_ref[...], w_ref[...], preferred_element_type=jnp.float32)
    y = y + b_ref[...]
    o_ref[...] = jnp.maximum(y, 0.0).astype(o_ref.dtype)


def linear_layer(x, gamma, beta, weight, bias, *,
                 row_tile=512, n_tile=None, out_dtype=None):
    """x: (N, L, D); weight: (D_out, D) torch-style; returns (N, L, D_out)."""
    N, L, D = x.shape
    D_out = weight.shape[0]
    rows = N * L
    out_dtype = x.dtype if out_dtype is None else out_dtype
    out_isz = jnp.dtype(out_dtype).itemsize

    d_pad = _round_up(D, 128)
    dout_full = _round_up(D_out, 128)

    # ---- VMEM-aware tile selection ----------------------------------------------
    vmem_cap = _vmem_capacity_bytes()
    vmem_budget = int(vmem_cap * 0.55)           # headroom for compiler temps

    # Row tile: large (default 512) to amortize per-grid-step overhead, multiple of 16
    # (bf16 scratch packs 16 sublanes/vreg), clamped to the actual row count.
    rt = max(16, min(_round_up(row_tile, 16), _round_up(rows, 16)))
    # Guarantee >= 2 row tiles when there's enough work so the "parallel" rows axis can
    # be sharded across both TensorCores on v7x.
    if rows >= 32 and _round_up(rows, rt) // rt < 2:
        rt = max(16, _round_up((rows + 1) // 2, 16))

    # D_out tile: prefer keeping the FULL weight resident (single j tile) so the weight
    # is DMA'd from HBM exactly once and reused across every row tile.
    tn = dout_full if n_tile is None else min(_round_up(n_tile, 128), dout_full)

    def _footprint(rt_, tn_):
        return (2 * rt_ * d_pad * 2            # bf16 x, double-buffered
                + rt_ * d_pad * 2              # bf16 LN scratch
                + 2 * d_pad * tn_ * 2          # bf16 W tiles (double-buffered alloc)
                + 4 * d_pad * 4                # gamma + beta
                + 4 * tn_ * 4                  # bias
                + 2 * rt_ * tn_ * out_isz)     # output, double-buffered

    # Fit into VMEM: shrink the row tile first (keeps the weight resident); only then
    # tile D_out (which re-introduces weight re-streaming).
    while _footprint(rt, tn) > vmem_budget and rt > 64:
        rt = max(16, _round_up(rt // 2, 16))
    while _footprint(rt, tn) > vmem_budget and tn > 128:
        tn = max(128, _round_up(tn // 2, 128))
    while _footprint(rt, tn) > vmem_budget and rt > 16:
        rt = max(16, _round_up(rt // 2, 16))
    # TODO(synk): add a K (feature-dim) tiling path (separate LN pass + K-tiled matmul
    # with an f32 accumulator) for very large D that still overflows VMEM at rt=16/tn=128.

    rows_pad = _round_up(rows, rt)
    dout_pad = _round_up(D_out, tn)
    grid = (rows_pad // rt, dout_pad // tn)

    # ---- Operand prep (once per call; folds under jit with static weights) -------
    x2 = jnp.pad(x.reshape(rows, D),
                 ((0, rows_pad - rows), (0, d_pad - D))).astype(jnp.bfloat16)
    gamma2 = jnp.pad(gamma.reshape(1, D).astype(jnp.float32), ((0, 0), (0, d_pad - D)))
    beta2 = jnp.pad(beta.reshape(1, D).astype(jnp.float32), ((0, 0), (0, d_pad - D)))
    w_t = jnp.pad(weight, ((0, dout_pad - D_out), (0, d_pad - D))).T.astype(jnp.bfloat16)
    bias2 = jnp.pad(bias.reshape(1, D_out).astype(jnp.float32),
                    ((0, 0), (0, dout_pad - D_out)))

    # Weight is only re-streamed per row tile when D_out is actually tiled.
    w_restream = 1 if dout_pad == tn else grid[0]
    cost = pl.CostEstimate(
        flops=2 * rows_pad * d_pad * dout_pad,
        transcendentals=rows_pad,
        bytes_accessed=(x2.size * x2.dtype.itemsize
                        + w_restream * w_t.size * w_t.dtype.itemsize
                        + (gamma2.size + beta2.size + bias2.size) * 4
                        + rows_pad * dout_pad * out_isz),
    )

    kernel = functools.partial(_linear_layer_kernel, d_true=D, d_pad=d_pad)

    out2 = pl.pallas_call(
        kernel,
        out_shape=jax.ShapeDtypeStruct((rows_pad, dout_pad), out_dtype),
        grid_spec=pltpu.PrefetchScalarGridSpec(
            num_scalar_prefetch=0,
            grid=grid,
            in_specs=[
                pl.BlockSpec((rt, d_pad), lambda i, j: (i, 0)),      # x rows tile (bf16)
                pl.BlockSpec((1, d_pad), lambda i, j: (0, 0)),       # gamma
                pl.BlockSpec((1, d_pad), lambda i, j: (0, 0)),       # beta
                pl.BlockSpec((d_pad, tn), lambda i, j: (0, j)),      # weight^T tile
                pl.BlockSpec((1, tn), lambda i, j: (0, j)),          # bias tile
            ],
            out_specs=pl.BlockSpec((rt, tn), lambda i, j: (i, j)),
            scratch_shapes=[pltpu.VMEM((rt, d_pad), jnp.bfloat16)],
        ),
        compiler_params=pltpu.CompilerParams(
            # rows axis megacore-parallel; D_out axis MUST stay sequential ("arbitrary")
            # so the LN scratch computed at j == 0 is valid for all j > 0.
            dimension_semantics=("parallel", "arbitrary"),
            vmem_limit_bytes=int(vmem_cap * 0.70),
        ),
        cost_estimate=cost,
    )(x2, gamma2, beta2, w_t, bias2)

    return out2[:rows, :D_out].reshape(N, L, D_out)


def _reference(x, gamma, beta, weight, bias):
    xf = x.astype(jnp.float32)
    mean = jnp.mean(xf, axis=-1, keepdims=True)
    var = jnp.mean((xf - mean) ** 2, axis=-1, keepdims=True)
    xn = (xf - mean) / jnp.sqrt(var + LN_EPS) * gamma + beta
    y = xn @ weight.T + bias
    return jnp.maximum(y, 0.0).astype(x.dtype)


if __name__ == "__main__":
    N, L, D_in, D_out = 2, 8, 32, 64

    key = jax.random.PRNGKey(0)
    kx, kw, kb = jax.random.split(key, 3)

    x = jax.random.normal(kx, (N, L, D_in), dtype=jnp.float32)

    gamma = jnp.ones((D_in,), dtype=jnp.float32)         # LayerNorm weight
    beta = jnp.zeros((D_in,), dtype=jnp.float32)         # LayerNorm bias
    bound = 1.0 / (D_in ** 0.5)
    weight = jax.random.uniform(kw, (D_out, D_in), minval=-bound, maxval=bound,
                                dtype=jnp.float32)       # nn.Linear weight (out, in)
    bias = jax.random.uniform(kb, (D_out,), minval=-bound, maxval=bound,
                              dtype=jnp.float32)         # nn.Linear bias

    out = linear_layer(x, gamma, beta, weight, bias)
    out = jax.block_until_ready(out)

    ref = _reference(x, gamma, beta, weight, bias)
    assert out.shape == (N, L, D_out), out.shape
    # bf16 input stream + bf16 GEMM operands with f32 accumulation vs f32 reference.
    assert jnp.allclose(out, ref, atol=3e-2, rtol=3e-2), "mismatch vs reference"

    print("KERNEL_OK")
</pallas_src>

<mosaic_0001>
module attributes {stable_mosaic.version = 11 : i64} {
  func.func @_linear_layer_kernel(%arg0: i32, %arg1: i32, %arg2: memref<16x128xbf16, #tpu.memory_space<vmem>>, %arg3: memref<1x128xf32, #tpu.memory_space<vmem>>, %arg4: memref<1x128xf32, #tpu.memory_space<vmem>>, %arg5: memref<128x128xbf16, #tpu.memory_space<vmem>>, %arg6: memref<1x128xf32, #tpu.memory_space<vmem>>, %arg7: memref<16x128xf32, #tpu.memory_space<vmem>>, %arg8: memref<16x128xbf16, #tpu.memory_space<vmem>>) attributes {dimension_semantics = [#tpu.dimension_semantics<parallel>, #tpu.dimension_semantics<arbitrary>], iteration_bounds = array<i64: 1, 1>, scalar_prefetch = 0 : i64, scratch_operands = 1 : i64, tpu.core_type = #tpu.core_type<tc>, window_params = [{transform_indices = @transform_0, window_bounds = array<i64: 16, 128>}, {pipeline_mode = #tpu.pipeline_mode<synchronous>, transform_indices = @transform_1, window_bounds = array<i64: 1, 128>}, {pipeline_mode = #tpu.pipeline_mode<synchronous>, transform_indices = @transform_2, window_bounds = array<i64: 1, 128>}, {transform_indices = @transform_3, window_bounds = array<i64: 128, 128>}, {transform_indices = @transform_4, window_bounds = array<i64: 1, 128>}, {transform_indices = @transform_5, window_bounds = array<i64: 16, 128>}]} {
    %c0_i32 = arith.constant 0 : i32
    %0 = arith.cmpi eq, %arg1, %c0_i32 : i32
    %1 = arith.extui %0 : i1 to i32
    %c0_i32_0 = arith.constant 0 : i32
    %2 = arith.cmpi ne, %1, %c0_i32_0 : i32
    scf.if %2 {
      %c0_9 = arith.constant 0 : index
      %c0_10 = arith.constant 0 : index
      %12 = vector.load %arg2[%c0_9, %c0_10] : memref<16x128xbf16, #tpu.memory_space<vmem>>, vector<16x128xbf16>
      %13 = arith.extf %12 : vector<16x128xbf16> to vector<16x128xf32>
      %cst_11 = arith.constant dense<0.000000e+00> : vector<16xf32>
      %14 = vector.multi_reduction <add>, %13, %cst_11 [1] : vector<16x128xf32> to vector<16xf32>
      %15 = vector.shape_cast %14 : vector<16xf32> to vector<16x1xf32>
      %cst_12 = arith.constant 3.125000e-02 : f32
      %16 = vector.broadcast %cst_12 : f32 to vector<16x1xf32>
      %17 = arith.mulf %15, %16 : vector<16x1xf32>
      %18 = vector.broadcast %17 : vector<16x1xf32> to vector<16x128xf32>
      %19 = arith.subf %13, %18 : vector<16x128xf32>
      %20 = tpu.iota {dimensions = array<i32: 1>} : vector<1x128xi32>
      %c32_i32 = arith.constant 32 : i32
      %21 = vector.broadcast %c32_i32 : i32 to vector<1x128xi32>
      %22 = arith.cmpi slt, %20, %21 : vector<1x128xi32>
      %cst_13 = arith.constant 0.000000e+00 : f32
      %23 = vector.shape_cast %22 : vector<1x128xi1> to vector<1x128xi1>
      %24 = vector.broadcast %23 : vector<1x128xi1> to vector<16x128xi1>
      %25 = vector.broadcast %cst_13 : f32 to vector<16x128xf32>
      %26 = arith.select %24, %19, %25 : vector<16x128xi1>, vector<16x128xf32>
      %27 = arith.mulf %26, %26 : vector<16x128xf32>
      %cst_14 = arith.constant dense<0.000000e+00> : vector<16xf32>
      %28 = vector.multi_reduction <add>, %27, %cst_14 [1] : vector<16x128xf32> to vector<16xf32>
      %29 = vector.shape_cast %28 : vector<16xf32> to vector<16x1xf32>
      %cst_15 = arith.constant 3.125000e-02 : f32
      %30 = vector.broadcast %cst_15 : f32 to vector<16x1xf32>
      %31 = arith.mulf %29, %30 : vector<16x1xf32>
      %cst_16 = arith.constant 9.99999974E-6 : f32
      %32 = vector.broadcast %cst_16 : f32 to vector<16x1xf32>
      %33 = arith.addf %31, %32 : vector<16x1xf32>
      %34 = math.rsqrt %33 : vector<16x1xf32>
      %35 = vector.broadcast %34 : vector<16x1xf32> to vector<16x128xf32>
      %36 = arith.mulf %26, %35 : vector<16x128xf32>
      %c0_17 = arith.constant 0 : index
      %c0_18 = arith.constant 0 : index
      %37 = vector.load %arg3[%c0_17, %c0_18] : memref<1x128xf32, #tpu.memory_space<vmem>>, vector<1x128xf32>
      %38 = vector.broadcast %37 : vector<1x128xf32> to vector<16x128xf32>
      %39 = arith.mulf %36, %38 : vector<16x128xf32>
      %c0_19 = arith.constant 0 : index
      %c0_20 = arith.constant 0 : index
      %40 = vector.load %arg4[%c0_19, %c0_20] : memref<1x128xf32, #tpu.memory_space<vmem>>, vector<1x128xf32>
      %41 = vector.broadcast %40 : vector<1x128xf32> to vector<16x128xf32>
      %42 = arith.addf %39, %41 : vector<16x128xf32>
      %43 = arith.truncf %42 : vector<16x128xf32> to vector<16x128xbf16>
      %c0_21 = arith.constant 0 : index
      %c0_22 = arith.constant 0 : index
      %44 = vector.load %arg8[%c0_21, %c0_22] : memref<16x128xbf16, #tpu.memory_space<vmem>>, vector<16x128xbf16>
      tpu.vector_store %arg8[%c0_21, %c0_22], %43 {strides = array<i32>} : memref<16x128xbf16, #tpu.memory_space<vmem>>, vector<16x128xbf16>,
    } else {
    }
    %c0 = arith.constant 0 : index
    %c0_1 = arith.constant 0 : index
    %3 = vector.load %arg8[%c0, %c0_1] : memref<16x128xbf16, #tpu.memory_space<vmem>>, vector<16x128xbf16>
    %c0_2 = arith.constant 0 : index
    %c0_3 = arith.constant 0 : index
    %4 = vector.load %arg5[%c0_2, %c0_3] : memref<128x128xbf16, #tpu.memory_space<vmem>>, vector<128x128xbf16>
    %cst = arith.constant dense<0.000000e+00> : vector<16x128xf32>
    %5 = tpu.matmul %3, %4, %cst {dimension_numbers = #tpu.dot_dimension_numbers<[1], [0], [0], [1], [0, 0, 1, 1], [], []>} : vector<16x128xbf16>, vector<128x128xbf16>, vector<16x128xf32> -> vector<16x128xf32>
    %c0_4 = arith.constant 0 : index
    %c0_5 = arith.constant 0 : index
    %6 = vector.load %arg6[%c0_4, %c0_5] : memref<1x128xf32, #tpu.memory_space<vmem>>, vector<1x128xf32>
    %7 = vector.broadcast %6 : vector<1x128xf32> to vector<16x128xf32>
    %8 = arith.addf %5, %7 : vector<16x128xf32>
    %cst_6 = arith.constant 0.000000e+00 : f32
    %9 = vector.broadcast %cst_6 : f32 to vector<16x128xf32>
    %10 = arith.maximumf %8, %9 : vector<16x128xf32>
    %c0_7 = arith.constant 0 : index
    %c0_8 = arith.constant 0 : index
    %11 = vector.load %arg7[%c0_7, %c0_8] : memref<16x128xf32, #tpu.memory_space<vmem>>, vector<16x128xf32>
    tpu.vector_store %arg7[%c0_7, %c0_8], %10 {strides = array<i32>} : memref<16x128xf32, #tpu.memory_space<vmem>>, vector<16x128xf32>,
    return
  }
  func.func @transform_0(%arg0: i32, %arg1: i32) -> (i32, i32) {
    %c0_i32 = arith.constant 0 : i32
    %c0_i32_0 = arith.constant 0 : i32
    return %arg0, %c0_i32 : i32, i32
  }
  func.func @transform_1(%arg0: i32, %arg1: i32) -> (i32, i32) {
    %c0_i32 = arith.constant 0 : i32
    %c0_i32_0 = arith.constant 0 : i32
    %c0_i32_1 = arith.constant 0 : i32
    return %c0_i32, %c0_i32_0 : i32, i32
  }
  func.func @transform_2(%arg0: i32, %arg1: i32) -> (i32, i32) {
    %c0_i32 = arith.constant 0 : i32
    %c0_i32_0 = arith.constant 0 : i32
    %c0_i32_1 = arith.constant 0 : i32
    return %c0_i32, %c0_i32_0 : i32, i32
  }
  func.func @transform_3(%arg0: i32, %arg1: i32) -> (i32, i32) {
    %c0_i32 = arith.constant 0 : i32
    %c0_i32_0 = arith.constant 0 : i32
    return %c0_i32, %arg1 : i32, i32
  }
  func.func @transform_4(%arg0: i32, %arg1: i32) -> (i32, i32) {
    %c0_i32 = arith.constant 0 : i32
    %c0_i32_0 = arith.constant 0 : i32
    return %c0_i32, %arg1 : i32, i32
  }
  func.func @transform_5(%arg0: i32, %arg1: i32) -> (i32, i32) {
    %c0_i32 = arith.constant 0 : i32
    return %arg0, %arg1 : i32, i32
  }
}

</mosaic_0001>

<bundles_post_ra>
// kernel: tpu_custom_call.1
= control target key start
LH: loop header
LB: loop body
LE: loop exit
PB: predicated region body
PF: predicated region fallthrough
CT: control target
= control target key end

     0   :  { %10 = vsyncpa [#allocation4], 0  ;;  %s463_s0 = inlined_call_operand.hbm [shape: bf16[16,128], index: 0, kind: input, shape index: {}]   ;;  %s464_s1 = inlined_call_operand.vmem [shape: f32[1,128], index: 1, kind: input, shape index: {}]   ;;  %s465_s2 = inlined_call_operand.vmem [shape: f32[1,128], index: 2, kind: input, shape index: {}]   ;;  %s466_s3 = inlined_call_operand.hbm [shape: bf16[128,128], index: 3, kind: input, shape index: {}]   ;;  %s467_s4 = inlined_call_operand.vmem [shape: f32[1,128], index: 4, kind: input, shape index: {}]   ;;  %s468_s5 = inlined_call_operand.hbm [shape: f32[16,128], index: 5, kind: output, shape index: {}]  }
   0x1   :  { %11 = vsyncpa [#allocation7], 0 }
   0x2   :  { %12 = vsyncpa [#allocation5], 0  ;;  %s379_s18 = smov [#allocation3]   ;;  %s307_s22 = scalar_lea.hbm %s463_s0, 128 }
   0x3   :  { %s18_s19 = sshll.u32 %s379_s18, 4  ;;  %p308_p0 = scmp.ne.s32.totalorder %s463_s0, %s307_s22  ;;  %s19_s19 = int_to_ptr.vmem [resolvable:$true] %s18_s19 }
   0x4   :  { %p311_p1 = scmp.lt.u32.totalorder %s307_s22, %s463_s0 }
   0x6   :  { %p313_p2 = pnand %p311_p1, %p308_p0 }
   0x8   :  { %316 = shalt.err (!%p313_p2)
}
   0x9   :  { %s317_s27 = scalar_lea.vmem %s19_s19, 128  ;;  %p322_p4 = scmp.lt.s32.totalorder %s19_s19, %s19_s19 }
   0xa   :  { %p318_p3 = scmp.ne.s32.totalorder %s19_s19, %s317_s27  ;;  %p323_p5 = scmp.lt.s32.totalorder %s317_s27, %s317_s27 }
   0xc   :  { %p324_p6 = por %p323_p5, %p322_p4 }
   0xe   :  { %p325_p7 = pnand %p324_p6, %p318_p3 }
  0x10   :  { %328 = shalt.err (!%p325_p7)
}
  0x11   :  { %s380_s28 = smov 64   ;;  %s381_s29 = smov 4  }
  0x12   :  { %24 = dma.hbm_to_vmem [thread:$0]  %s463_s0, 128, %s19_s19, [#allocation4], %s380_s28, %s380_s28, %s381_s29  }
  0x13   :  { %s382_s7 = smov [#allocation6]   ;;  %s329_s11 = scalar_lea.hbm %s466_s3, 1024 }
  0x14   :  { %s34_s8 = sshll.u32 %s382_s7, 4  ;;  %p330_p8 = scmp.ne.s32.totalorder %s466_s3, %s329_s11  ;;  %s35_s8 = int_to_ptr.vmem [resolvable:$true] %s34_s8 }
  0x15   :  { %p333_p9 = scmp.lt.u32.totalorder %s329_s11, %s466_s3 }
  0x17   :  { %p335_p10 = pnand %p333_p9, %p330_p8 }
  0x19   :  { %338 = shalt.err (!%p335_p10)
}
  0x1a   :  { %s339_s16 = scalar_lea.vmem %s35_s8, 1024  ;;  %p344_p12 = scmp.lt.s32.totalorder %s35_s8, %s35_s8 }
  0x1b   :  { %p340_p11 = scmp.ne.s32.totalorder %s35_s8, %s339_s16  ;;  %p345_p13 = scmp.lt.s32.totalorder %s339_s16, %s339_s16 }
  0x1d   :  { %p346_p0 = por %p345_p13, %p344_p12 }
  0x1f   :  { %p347_p1 = pnand %p346_p0, %p340_p11 }
  0x21   :  { %350 = shalt.err (!%p347_p1)
}
  0x22   :  { %40 = dma.hbm_to_vmem [thread:$0]  %s466_s3, 1024, %s35_s8, [#allocation7], %s380_s28, %s380_s28, %s381_s29  }
  0x23   :  { %373 = dma.done.wait [#allocation4], 128  }
  0x24   :  { %374 = vsyncadd [#allocation4], 4294967168 }
  0x25   :  { %375 = dma.done.wait [#allocation7], 1024  }
  0x26   :  { %376 = vsyncadd [#allocation7], 4294966272  ;;  %v254_v0 = vld [vmem:[#allocation3] sm:$0xff]   ;;  %v295_v3 = vld [vmem:[#allocation6] sm:$0xff]   ;;  %v383_v4 = vmov 0.0   ;;  %v66_v5 = vlaneseq  ;;  %vm384_vm1 = vmmov 0  }
  0x27   :  { %v255_v1 = vunpack.c.l.bf16 %v254_v0  ;;  %v256_v2 = vunpack.c.h.bf16 %v254_v0  ;;  %266 = vmatprep.subr.bf16.mxu0 %v383_v4  ;;  %v296_v17 = vld [vmem:[#allocation6 + $0x8] sm:$0xff]   ;;  %v297_v18 = vld [vmem:[#allocation6 + $0x10] sm:$0xff]   ;;  %v298_v19 = vld [vmem:[#allocation6 + $0x18] sm:$0xff]   ;;  %282 = vmatprep.mubr.msk.bf16.mxu0 %vm384_vm1, %v383_v4 }
  0x28   :  { %267 = vmatpush3.bf16.msra.mxu0 %v295_v3  ;;  %v67_v6 = vand.u32 127, %v66_v5  ;;  %v299_v20 = vld [vmem:[#allocation6 + $0x20] sm:$0xff]   ;;  %v300_v21 = vld [vmem:[#allocation6 + $0x28] sm:$0xff]   ;;  %v301_v22 = vld [vmem:[#allocation6 + $0x30] sm:$0xff]  }
  0x29   :  { %58 = vadd.xlane.f32.xlu0 %v255_v1  ;;  %268 = vmatprep.subr.bf16.mxu0 %v383_v4  ;;  %v302_v23 = vld [vmem:[#allocation6 + $0x38] sm:$0xff]  }
  0x2a   :  { %vm68_vm0 = vcmp.lt.s32.totalorder %v67_v6, 32  ;;  %v242_v32 = vld [vmem:[%s464_s1] ss:$0 sm:$0xff]  ;;  %s385_s1 = smov [#allocation8]  }
  0x2b   :  { %v243_v36 = vld [vmem:[%s465_s2] ss:$0 sm:$0xff]  ;;  %s229_s23 = sshll.u32 %s385_s1, 4  ;;  %s230_s23 = int_to_ptr.vmem [resolvable:$true] %s229_s23 }
  0x2c   :  { %269 = vmatpush3.bf16.msra.mxu0 %v296_v17  ;;  %v244_v41 = vld [vmem:[%s467_s4] ss:$0 sm:$0xff]  ;;  %s351_s2 = scalar_lea.vmem %s230_s23, 256  ;;  %p356_p3 = scmp.lt.s32.totalorder %s230_s23, %s230_s23 }
  0x2d   :  { %60 = vadd.xlane.f32.xlu0 %v256_v2  ;;  %270 = vmatprep.subr.bf16.mxu0 %v383_v4  ;;  %p352_p2 = scmp.ne.s32.totalorder %s230_s23, %s351_s2  ;;  %p357_p4 = scmp.lt.s32.totalorder %s351_s2, %s351_s2 }
  0x2f   :  { %p358_p5 = por %p357_p4, %p356_p3 }
  0x30   :  { %271 = vmatpush3.bf16.msra.mxu0 %v297_v18 }
  0x31   :  { %272 = vmatprep.subr.bf16.mxu0 %v383_v4  ;;  %p359_p6 = pnand %p358_p5, %p352_p2 }
  0x34   :  { %273 = vmatpush3.bf16.msra.mxu0 %v298_v19 }
  0x35   :  { %274 = vmatprep.subr.bf16.mxu0 %v383_v4 }
  0x38   :  { %275 = vmatpush3.bf16.msra.mxu0 %v299_v20 }
  0x39   :  { %276 = vmatprep.subr.bf16.mxu0 %v383_v4 }
  0x3c   :  { %277 = vmatpush3.bf16.msra.mxu0 %v300_v21 }
  0x3d   :  { %278 = vmatprep.subr.bf16.mxu0 %v383_v4 }
  0x40   :  { %279 = vmatpush3.bf16.msra.mxu0 %v301_v22 }
  0x41   :  { %280 = vmatprep.subr.bf16.mxu0 %v383_v4 }
  0x44   :  { %281 = vmatpush3.bf16.msra.mxu0 %v302_v23 }
  0xb6   :  { %v59_v7 = vpop.xlane.xlu0 %58 }
  0xb7   :  { %v62_v8 = vmul.f32 0.03125, %v59_v7 }
  0xb9   :  { %v64_v9 = vsub.f32 %v255_v1, %v62_v8 }
  0xba   :  { %v61_v10 = vpop.xlane.xlu0 %60 }
  0xbb   :  { %v63_v11 = vmul.f32 0.03125, %v61_v10  ;;  %v71_v12 = vsel %vm68_vm0, %v64_v9, 0.0 }
  0xbc   :  { %v73_v13 = vmul.f32 %v71_v12, %v71_v12 }
  0xbd   :  { %v65_v14 = vsub.f32 %v256_v2, %v63_v11 }
  0xbe   :  { %75 = vadd.xlane.f32.xlu1 %v73_v13 }
  0xbf   :  { %v72_v15 = vsel %vm68_vm0, %v65_v14, 0.0 }
  0xc0   :  { %v74_v16 = vmul.f32 %v72_v15, %v72_v15 }
  0xc2   :  { %77 = vadd.xlane.f32.xlu1 %v74_v16 }
 0x14b   :  { %v76_v24 = vpop.xlane.xlu1 %75 }
 0x14c   :  { %v79_v25 = vmul.f32 0.03125, %v76_v24 }
 0x14e   :  { %v81_v26 = vadd.f32 1e-05, %v79_v25 }
 0x14f   :  { %v78_v27 = vpop.xlane.xlu1 %77 }
 0x150   :  { %303 = vrsqrt.f32 %v81_v26  ;;  %v80_v28 = vmul.f32 0.03125, %v78_v27 }
 0x152   :  { %v82_v29 = vadd.f32 1e-05, %v80_v28 }
 0x154   :  { %305 = vrsqrt.f32 %v82_v29 }
 0x15a   :  { %v304_v30 = vpop.eup %303 }
 0x15b   :  { %v85_v31 = vmul.f32 %v304_v30, %v71_v12 }
 0x15d   :  { %v94_v35 = vmul.f32 %v242_v32, %v85_v31 }
 0x15e   :  { %v306_v33 = vpop.eup %305 }
 0x15f   :  { %v86_v34 = vmul.f32 %v306_v33, %v72_v15  ;;  %v103_v38 = vadd.f32 %v243_v36, %v94_v35 }
 0x161   :  { %v95_v37 = vmul.f32 %v242_v32, %v86_v34 }
 0x163   :  { %v104_v39 = vadd.f32 %v243_v36, %v95_v37 }
 0x165   :  { %v105_v40 = vpack.c.bf16 %v104_v39, %v103_v38 }
 0x167   :  { %283 = vmatmul.mubr.bf16.vlgmr.msra.gmra.mrb[0].mxu0 %v105_v40 }
 0x23a   :  { %v213_v42 = vpop.f32.mrb[0].mxu0 }
 0x23b   :  { %v214_v43 = vadd.f32 %v244_v41, %v213_v42  ;;  %v284_v44 = vpop.f32.mrb[1].mxu0 }
 0x23c   :  { %v216_v45 = vpop.f32.mrb[2].mxu0 }
 0x23d   :  { %v220_v46 = vmax.f32 %v214_v43, 0.0  ;;  %v217_v47 = vadd.f32 %v244_v41, %v216_v45  ;;  %v285_v48 = vpop.f32.mrb[3].mxu0 }
 0x23f   :  { %222 = vst [vmem:[#allocation8] sm:$0xff] %v220_v46  ;;  %v221_v49 = vmax.f32 %v217_v47, 0.0 }
 0x241   :  { %223 = vst [vmem:[#allocation8 + $0x8] sm:$0xff] %v221_v49 }
 0x242   :  { %362 = shalt.err (!%p359_p6)
}
 0x243   :  { %s363_s25 = scalar_lea.hbm %s468_s5, 256 }
 0x244   :  { %p364_p7 = scmp.ne.s32.totalorder %s468_s5, %s363_s25  ;;  %p367_p8 = scmp.lt.u32.totalorder %s363_s25, %s468_s5 }
 0x246   :  { %p369_p9 = pnand %p367_p8, %p364_p7 }
 0x248   :  { %372 = shalt.err (!%p369_p9)
}
 0x249   :  { %s386_s30 = smov 128   ;;  %s387_s6 = smov 8  }
 0x24a   :  { %235 = dma.vmem_to_hbm [thread:$0]  %s230_s23, 256, %s468_s5, [#allocation5], %s386_s30, %s386_s30, %s387_s6  }
 0x24b   :  { %377 = dma.done.wait [#allocation5], 256  }
 0x24c   :  { %378 = vsyncadd [#allocation5], 4294967040 }
 0x24d   :  { %239 = vsyncpa [#allocation4], 1 }
 0x24e   :  { %240 = vsyncpa [#allocation7], 1 }
 0x24f   :  { %241 = vsyncpa [#allocation5], 1 }

</bundles_post_ra>
